<compile_context>
chip_gen: v6e
topology: v6e:2x2x1
jax: 0.10.0
libtpu: 0.0.40
codegen_flags: <defaults>
</compile_context>

<pallas_src>
import jax
import jax.numpy as jnp
from jax.experimental import pallas as pl
from jax.experimental.pallas import tpu as pltpu

_FAST_PATH_BYTES = 256 * 1024   # single-block path only below this
_MIN_GRID_STEPS = 4             # keep the pipeline full on the grid path
_LANE_CANDIDATES = (1024, 512, 256, 128)


def _h_swish_kernel(x_ref, o_ref):
    x = x_ref[...]
    # relu6(x + 3) / 6  ==  clip(x + 3, 0, 6) * (1/6)   (<= 1 ulp vs divide)
    hsig = jnp.clip(x + 3.0, 0.0, 6.0) * (1.0 / 6.0)
    o_ref[...] = (x * hsig).astype(o_ref.dtype)


def _pick_lanes(total: int):
    """Largest lane-dense last dim (multiple of 128) that divides `total`."""
    for lanes in _LANE_CANDIDATES:
        if total % lanes == 0:
            return lanes
    return None


def _chip_tiling():
    """Per-generation (tile_bytes, vmem_limit_bytes).

    BlockSpec double-buffers input and output, so VMEM use ~= 4 * tile_bytes.
    v5e/v6e: 128 MiB physical VMEM (16 / 32 MiB default scoped limits).
    v7x:     64 MiB VMEM per TensorCore.
    """
    vmem_bytes = None
    try:
        vmem_bytes = int(pltpu.get_tpu_info().vmem_capacity_bytes)
    except Exception:  # query unavailable -> conservative, safe-everywhere default
        vmem_bytes = None
    if vmem_bytes is not None and vmem_bytes <= (96 << 20):
        # v7x-class: 6 MiB tiles -> 24 MiB double-buffered; set the scoped
        # limit explicitly (default 32 MiB) while leaving headroom of 64 MiB.
        return 6 << 20, 48 << 20
    # v5e / v6e class: 4 MiB tiles -> 16 MiB double-buffered.  Raise the limit
    # past v5e's 16 MiB default scoped VMEM (physical 128 MiB allows it).
    return 4 << 20, 24 << 20


def h_swish(x: jax.Array) -> jax.Array:
    """h_swish on any-rank tensor (NCHW in MobileNetV3); elementwise."""
    orig_shape = x.shape
    total = x.size
    if total == 0:
        return x

    itemsize = jnp.dtype(x.dtype).itemsize
    # sublane packing: f32 -> 8 rows/vreg, bf16 -> 16, int8 -> 32
    sub = {4: 8, 2: 16, 1: 32}.get(itemsize, 8)

    flat = x.reshape(-1)
    lanes = _pick_lanes(total)
    padded_total = total
    if lanes is None:
        # Rare fallback: element count not a multiple of 128.  Pad minimally to
        # 128 lanes (h_swish(0) == 0, so padding is harmless); the pad/slice
        # costs extra HBM passes, but this path is never hit for the usual
        # MobileNetV3 NCHW feature maps.
        lanes = 128
        padded_total = pl.cdiv(total, lanes) * lanes
        flat = jnp.pad(flat, (0, padded_total - total))

    rows = padded_total // lanes
    x2d = flat.reshape(rows, lanes)
    out_shape = jax.ShapeDtypeStruct((rows, lanes), x.dtype)

    if padded_total * itemsize <= _FAST_PATH_BYTES:
        # Truly tiny tensors: one whole-array block, no grid-step overhead.
        out2d = pl.pallas_call(_h_swish_kernel, out_shape=out_shape)(x2d)
    else:
        tile_bytes, vmem_limit = _chip_tiling()
        # Rows per generation-sized tile, rounded to the sublane pack.
        tile_rows = max(sub, (tile_bytes // (lanes * itemsize)) // sub * sub)
        # Cap the tile so the grid has >= _MIN_GRID_STEPS steps (full pipeline).
        depth_rows = max(sub, pl.cdiv(pl.cdiv(rows, _MIN_GRID_STEPS), sub) * sub)
        tile_rows = min(tile_rows, depth_rows)
        grid = (pl.cdiv(rows, tile_rows),)

        out2d = pl.pallas_call(
            _h_swish_kernel,
            out_shape=out_shape,
            grid_spec=pltpu.PrefetchScalarGridSpec(
                num_scalar_prefetch=0,
                grid=grid,
                in_specs=[pl.BlockSpec((tile_rows, lanes), lambda i: (i, 0))],
                out_specs=pl.BlockSpec((tile_rows, lanes), lambda i: (i, 0)),
            ),
            compiler_params=pltpu.CompilerParams(
                dimension_semantics=("parallel",),
                vmem_limit_bytes=vmem_limit,
            ),
        )(x2d)

    out = out2d.reshape(-1)
    if padded_total != total:
        out = out[:total]
    return out.reshape(orig_shape)


def _h_swish_ref(x):
    return x * jnp.clip(x + 3.0, 0.0, 6.0) / 6.0


if __name__ == "__main__":
    key = jax.random.PRNGKey(0)
    k1, k2, k3 = jax.random.split(key, 3)

    # 1) Primary test: small NCHW feature map (MobileNetV3-like) -> fast path,
    #    adaptive lanes (2048 elems -> 1024 lanes, no padding).
    x = jax.random.normal(key, (2, 4, 16, 16), dtype=jnp.float32) * 4.0
    y = h_swish(x)
    jax.block_until_ready(y)
    assert y.shape == x.shape and y.dtype == x.dtype
    assert jnp.allclose(y, _h_swish_ref(x), atol=1e-6, rtol=1e-6), "mismatch (small path)"

    # 2) Tiled (grid) path: ~2.5 MiB f32 feature map, no padding, >=4 grid steps.
    x_big = jax.random.normal(k1, (4, 40, 64, 64), dtype=jnp.float32) * 4.0
    y_big = h_swish(x_big)
    jax.block_until_ready(y_big)
    assert jnp.allclose(y_big, _h_swish_ref(x_big), atol=1e-6, rtol=1e-6), "mismatch (tiled path)"

    # 3) Adaptive-lane path: 1536 elems -> 512 lanes, no padding.
    x_mid = jax.random.normal(k2, (2, 3, 16, 16), dtype=jnp.float32) * 4.0
    y_mid = h_swish(x_mid)
    jax.block_until_ready(y_mid)
    assert jnp.allclose(y_mid, _h_swish_ref(x_mid), atol=1e-6, rtol=1e-6), "mismatch (adaptive lanes)"

    # 4) Ragged fallback (1155 elems, not a multiple of 128) + bf16.
    x_odd = (jax.random.normal(k3, (3, 5, 7, 11), dtype=jnp.float32) * 4.0).astype(jnp.bfloat16)
    y_odd = h_swish(x_odd)
    jax.block_until_ready(y_odd)
    assert y_odd.shape == x_odd.shape and y_odd.dtype == x_odd.dtype
    assert jnp.allclose(
        y_odd.astype(jnp.float32), _h_swish_ref(x_odd.astype(jnp.float32)),
        atol=2e-2, rtol=2e-2,
    ), "mismatch (ragged / bf16 fallback)"

    print("KERNEL_OK")
</pallas_src>

<mosaic_0001>
module attributes {stable_mosaic.version = 11 : i64} {
  func.func @_h_swish_kernel(%arg0: memref<2x1024xf32, #tpu.memory_space<vmem>>, %arg1: memref<2x1024xf32, #tpu.memory_space<vmem>>) attributes {dimension_semantics = [], scalar_prefetch = 0 : i64, scratch_operands = 0 : i64, tpu.core_type = #tpu.core_type<tc>} {
    %c0 = arith.constant 0 : index
    %c0_0 = arith.constant 0 : index
    %0 = vector.load %arg0[%c0, %c0_0] : memref<2x1024xf32, #tpu.memory_space<vmem>>, vector<2x1024xf32>
    %cst = arith.constant 3.000000e+00 : f32
    %1 = vector.broadcast %cst : f32 to vector<2x1024xf32>
    %2 = arith.addf %0, %1 : vector<2x1024xf32>
    %cst_1 = arith.constant 0.000000e+00 : f32
    %cst_2 = arith.constant 6.000000e+00 : f32
    %3 = vector.broadcast %cst_1 : f32 to vector<2x1024xf32>
    %4 = arith.maximumf %3, %2 : vector<2x1024xf32>
    %5 = vector.broadcast %cst_2 : f32 to vector<2x1024xf32>
    %6 = arith.minimumf %5, %4 : vector<2x1024xf32>
    %cst_3 = arith.constant 0.166666672 : f32
    %7 = vector.broadcast %cst_3 : f32 to vector<2x1024xf32>
    %8 = arith.mulf %6, %7 : vector<2x1024xf32>
    %9 = arith.mulf %0, %8 : vector<2x1024xf32>
    %c0_4 = arith.constant 0 : index
    %c0_5 = arith.constant 0 : index
    %10 = vector.load %arg1[%c0_4, %c0_5] : memref<2x1024xf32, #tpu.memory_space<vmem>>, vector<2x1024xf32>
    tpu.vector_store %arg1[%c0_4, %c0_5], %9 {strides = array<i32>} : memref<2x1024xf32, #tpu.memory_space<vmem>>, vector<2x1024xf32>,
    return
  }
}

</mosaic_0001>

<bundles_post_ra>
// kernel: tpu_custom_call.1
= control target key start
LH: loop header
LB: loop body
LE: loop exit
PB: predicated region body
PF: predicated region fallthrough
CT: control target
= control target key end

     0   :  { %6 = vsyncpa [#allocation3], 0  ;;  %s114_s0 = inlined_call_operand.hbm [shape: f32[2,1024], index: 0, kind: input, shape index: {}]   ;;  %s115_s1 = inlined_call_operand.hbm [shape: f32[2,1024], index: 1, kind: output, shape index: {}]  }
   0x1   :  { %7 = vsyncpa [#allocation4], 0  ;;  %s96_s6 = smov [#allocation2]  }
   0x2   :  { %s14_s7 = sshll.u32 %s96_s6, 4  ;;  %s15_s7 = int_to_ptr.vmem [resolvable:$true] %s14_s7 }
   0x3   :  { %s60_s8 = scalar_lea.vmem %s15_s7, 256  ;;  %p65_p1 = scmp.lt.s32.totalorder %s15_s7, %s15_s7 }
   0x4   :  { %p61_p0 = scmp.ne.s32.totalorder %s15_s7, %s60_s8  ;;  %p66_p2 = scmp.lt.s32.totalorder %s60_s8, %s60_s8 }
   0x6   :  { %p67_p3 = por %p66_p2, %p65_p1 }
   0x8   :  { %p68_p4 = pnand %p67_p3, %p61_p0 }
   0xa   :  { %71 = shalt.err (!%p68_p4)
}
   0xb   :  { %17 = dma.hbm_to_vmem [thread:$0]  %s114_s0, 256, %s15_s7, [#allocation3]  }
   0xc   :  { %92 = dma.done.wait [#allocation3], 256  }
   0xd   :  { %93 = vsyncadd [#allocation3], 4294967040  ;;  %v21_v0 = vld [vmem:[#allocation2] sm:$0xff]  ;;  %v22_v1 = vld [vmem:[#allocation2 + $0x8] sm:$0xff]  ;;  %s97_s11 = smov [#allocation5]  }
   0xe   :  { %v23_v2 = vadd.f32 3.0, %v21_v0  ;;  %v24_v3 = vadd.f32 3.0, %v22_v1  ;;  %s41_s12 = sshll.u32 %s97_s11, 4  ;;  %s42_s12 = int_to_ptr.vmem [resolvable:$true] %s41_s12 }
   0xf   :  { %s72_s0 = scalar_lea.vmem %s42_s12, 256  ;;  %p77_p6 = scmp.lt.s32.totalorder %s42_s12, %s42_s12 }
  0x10   :  { %v25_v4 = vmax.f32 %v23_v2, 0.0  ;;  %v26_v5 = vmax.f32 %v24_v3, 0.0  ;;  %p73_p5 = scmp.ne.s32.totalorder %s42_s12, %s72_s0  ;;  %p78_p7 = scmp.lt.s32.totalorder %s72_s0, %s72_s0 }
  0x12   :  { %v27_v6 = vmin.f32 %v25_v4, 6.0  ;;  %v28_v7 = vmin.f32 %v26_v5, 6.0  ;;  %p79_p8 = por %p78_p7, %p77_p6 }
  0x14   :  { %v29_v8 = vmul.f32 0.16666667, %v27_v6  ;;  %v30_v9 = vmul.f32 0.16666667, %v28_v7  ;;  %p80_p9 = pnand %p79_p8, %p73_p5 }
  0x16   :  { %v31_v10 = vmul.f32 %v29_v8, %v21_v0  ;;  %v32_v11 = vmul.f32 %v30_v9, %v22_v1 }
  0x18   :  { %33 = vst [vmem:[#allocation5] sm:$0xff] %v31_v10  ;;  %34 = vst [vmem:[#allocation5 + $0x8] sm:$0xff] %v32_v11 }
  0x19   :  { %83 = shalt.err (!%p80_p9)
}
  0x1a   :  { %44 = dma.vmem_to_hbm [thread:$0]  %s42_s12, 256, %s115_s1, [#allocation4]  }
  0x1b   :  { %94 = dma.done.wait [#allocation4], 256  }
  0x1c   :  { %95 = vsyncadd [#allocation4], 4294967040 }
  0x1d   :  { %48 = vsyncpa [#allocation3], 1 }
  0x1e   :  { %49 = vsyncpa [#allocation4], 1 }

</bundles_post_ra>
